<compile_context>
chip_gen: v7x
topology: tpu7x:2x2x1
jax: 0.10.0
libtpu: 0.0.40
codegen_flags: <defaults>
</compile_context>

<pallas_src>
import functools

import jax
import jax.numpy as jnp
from jax.experimental import pallas as pl
from jax.experimental.pallas import tpu as pltpu

HIDDEN = 256
SUBLANE = 8


def _cdiv(a, b):
    return (a + b - 1) // b


def _round_up(n, m):
    return _cdiv(n, m) * m


def _pick_batch_tile(batch, block_rows):
    """Rows per grid step: <= block_rows, multiple of 8, and enough grid steps that
    (a) v7x's two TensorCores each see >= 2 blocks when batch allows, and
    (b) the ragged last block wastes at most 7 rows."""
    n_cap = _cdiv(batch, block_rows)                 # respect the VMEM/row cap
    n_cores = min(4, _cdiv(batch, SUBLANE))          # >= 4 blocks if batch >= 32
    n_blocks = max(n_cap, n_cores, 1)
    return _round_up(_cdiv(batch, n_blocks), SUBLANE)


def _actor_fc_kernel(x_ref, w1_ref, b1_ref, w2_ref, b2_ref, w3_ref, b3_ref, o_ref):
    # x tile: (tm, in_dim) f32 straight from HBM; weights are VMEM-resident bf16.
    x = x_ref[...].astype(jnp.bfloat16)              # cast in-register (VPU), no HBM pass

    h1 = jnp.dot(x, w1_ref[...], preferred_element_type=jnp.float32) + b1_ref[...]
    h1 = jnp.maximum(h1, 0.0)                        # ReLU on VPU

    h2 = jnp.dot(h1.astype(jnp.bfloat16), w2_ref[...],
                 preferred_element_type=jnp.float32) + b2_ref[...]
    h2 = jnp.maximum(h2, 0.0)                        # ReLU on VPU

    out = jnp.dot(h2.astype(jnp.bfloat16), w3_ref[...],
                  preferred_element_type=jnp.float32) + b3_ref[...]
    o_ref[...] = out.astype(o_ref.dtype)             # (tm, out_dim) masked-lane store


@functools.partial(jax.jit, static_argnames=("block_rows",))
def actor_fc_forward(x, w1, b1, w2, b2, w3, b3, *, block_rows=1024):
    """Pallas forward for ActorFC.

    x : (B, input_dim) float32
    w1: (input_dim, 256) bf16, b1: (1, 256) f32
    w2: (256, 256)       bf16, b2: (1, 256) f32
    w3: (256, output_dim) bf16, b3: (1, output_dim) f32
    returns action_scores: (B, output_dim) float32
    """
    batch, in_dim = x.shape
    hidden = w1.shape[1]
    out_dim = w3.shape[1]

    tm = _pick_batch_tile(batch, block_rows)
    grid = (pl.cdiv(batch, tm),)

    const = lambda i: (0, 0)   # weights/biases: same block every grid step -> stay in VMEM

    return pl.pallas_call(
        _actor_fc_kernel,
        out_shape=jax.ShapeDtypeStruct((batch, out_dim), jnp.float32),
        grid=grid,
        in_specs=[
            pl.BlockSpec((tm, in_dim), lambda i: (i, 0)),   # x: streamed over batch, raw f32
            pl.BlockSpec((in_dim, hidden), const),          # w1 (bf16, K=120 handled by MXU)
            pl.BlockSpec((1, hidden), const),               # b1
            pl.BlockSpec((hidden, hidden), const),          # w2
            pl.BlockSpec((1, hidden), const),               # b2
            pl.BlockSpec((hidden, out_dim), const),         # w3 (N = out_dim, unpadded)
            pl.BlockSpec((1, out_dim), const),              # b3
        ],
        out_specs=pl.BlockSpec((tm, out_dim), lambda i: (i, 0)),
        compiler_params=pltpu.CompilerParams(
            dimension_semantics=("parallel",)),             # shards batch across TCs on v7x
    )(x, w1, b1, w2, b2, w3, b3)


def init_actor_fc_params(key, input_dim, output_dim):
    """PyTorch-nn.Linear-style init (uniform +/- 1/sqrt(fan_in)); weights stored (in, out), f32."""
    dims = [(input_dim, HIDDEN), (HIDDEN, HIDDEN), (HIDDEN, output_dim)]
    params = []
    for fan_in, fan_out in dims:
        key, kw, kb = jax.random.split(key, 3)
        bound = 1.0 / jnp.sqrt(jnp.float32(fan_in))
        w = jax.random.uniform(kw, (fan_in, fan_out), jnp.float32, -bound, bound)
        b = jax.random.uniform(kb, (1, fan_out), jnp.float32, -bound, bound)
        params += [w, b]
    return tuple(params)


def prepare_actor_fc_params(w1, b1, w2, b2, w3, b3):
    """One-time (out-of-hot-path) weight prep: bf16 weights, f32 biases, (in, out) layout."""
    return (w1.astype(jnp.bfloat16), b1,
            w2.astype(jnp.bfloat16), b2,
            w3.astype(jnp.bfloat16), b3)


def actor_fc_reference_f32(x, w1, b1, w2, b2, w3, b3):
    """Pure-JAX f32 reference matching the PyTorch forward (also the better path for tiny batches)."""
    h1 = jnp.maximum(x @ w1 + b1, 0.0)
    h2 = jnp.maximum(h1 @ w2 + b2, 0.0)
    return h2 @ w3 + b3


def actor_fc_reference_bf16(x, w1, b1, w2, b2, w3, b3):
    """Pure-JAX reference using the same bf16-weight / f32-accumulate recipe as the kernel."""
    h1 = jnp.dot(x.astype(jnp.bfloat16), w1.astype(jnp.bfloat16),
                 preferred_element_type=jnp.float32) + b1
    h1 = jnp.maximum(h1, 0.0)
    h2 = jnp.dot(h1.astype(jnp.bfloat16), w2.astype(jnp.bfloat16),
                 preferred_element_type=jnp.float32) + b2
    h2 = jnp.maximum(h2, 0.0)
    return jnp.dot(h2.astype(jnp.bfloat16), w3.astype(jnp.bfloat16),
                   preferred_element_type=jnp.float32) + b3


if __name__ == "__main__":
    key = jax.random.PRNGKey(0)
    key, kx = jax.random.split(key)

    batch = 8
    input_dim = 120   # "state -> shape: batch_size X 120"
    output_dim = 20   # "action_scores -> shape: batch_size X 20" (raw scores, no softmax)

    x = jax.random.normal(kx, (batch, input_dim), jnp.float32)
    params_f32 = init_actor_fc_params(key, input_dim, output_dim)
    params = prepare_actor_fc_params(*params_f32)   # one-time bf16 weight prep

    out = actor_fc_forward(x, *params)
    out = jax.block_until_ready(out)
    assert out.shape == (batch, output_dim)

    # Strict check vs a reference that uses the same bf16-weight / f32-accumulate recipe.
    ref_matched = actor_fc_reference_bf16(x, *params_f32)
    assert jnp.allclose(out, ref_matched, atol=2e-3, rtol=2e-3), "mismatch vs bf16-matched reference"

    # Loose check vs the exact f32 PyTorch-equivalent forward (bf16 weight quantization error).
    ref_f32 = actor_fc_reference_f32(x, *params_f32)
    assert jnp.allclose(out, ref_f32, atol=6e-2, rtol=6e-2), "mismatch vs f32 reference"

    print("KERNEL_OK")
</pallas_src>

<mosaic_0001>
module attributes {stable_mosaic.version = 11 : i64} {
  func.func @_actor_fc_kernel(%arg0: i32, %arg1: memref<8x120xf32, #tpu.memory_space<vmem>>, %arg2: memref<120x256xbf16, #tpu.memory_space<vmem>>, %arg3: memref<1x256xf32, #tpu.memory_space<vmem>>, %arg4: memref<256x256xbf16, #tpu.memory_space<vmem>>, %arg5: memref<1x256xf32, #tpu.memory_space<vmem>>, %arg6: memref<256x20xbf16, #tpu.memory_space<vmem>>, %arg7: memref<1x20xf32, #tpu.memory_space<vmem>>, %arg8: memref<8x20xf32, #tpu.memory_space<vmem>>) attributes {dimension_semantics = [#tpu.dimension_semantics<parallel>], iteration_bounds = array<i64: 1>, scalar_prefetch = 0 : i64, scratch_operands = 0 : i64, tpu.core_type = #tpu.core_type<tc>, window_params = [{transform_indices = @transform_0, window_bounds = array<i64: 8, 120>}, {pipeline_mode = #tpu.pipeline_mode<synchronous>, transform_indices = @transform_1, window_bounds = array<i64: 120, 256>}, {pipeline_mode = #tpu.pipeline_mode<synchronous>, transform_indices = @transform_2, window_bounds = array<i64: 1, 256>}, {pipeline_mode = #tpu.pipeline_mode<synchronous>, transform_indices = @transform_3, window_bounds = array<i64: 256, 256>}, {pipeline_mode = #tpu.pipeline_mode<synchronous>, transform_indices = @transform_4, window_bounds = array<i64: 1, 256>}, {pipeline_mode = #tpu.pipeline_mode<synchronous>, transform_indices = @transform_5, window_bounds = array<i64: 256, 20>}, {pipeline_mode = #tpu.pipeline_mode<synchronous>, transform_indices = @transform_6, window_bounds = array<i64: 1, 20>}, {transform_indices = @transform_7, window_bounds = array<i64: 8, 20>}]} {
    %c0 = arith.constant 0 : index
    %c0_0 = arith.constant 0 : index
    %0 = vector.load %arg1[%c0, %c0_0] : memref<8x120xf32, #tpu.memory_space<vmem>>, vector<8x120xf32>
    %1 = arith.truncf %0 : vector<8x120xf32> to vector<8x120xbf16>
    %c0_1 = arith.constant 0 : index
    %c0_2 = arith.constant 0 : index
    %2 = vector.load %arg2[%c0_1, %c0_2] : memref<120x256xbf16, #tpu.memory_space<vmem>>, vector<120x256xbf16>
    %cst = arith.constant dense<0.000000e+00> : vector<8x256xf32>
    %3 = tpu.matmul %1, %2, %cst {dimension_numbers = #tpu.dot_dimension_numbers<[1], [0], [0], [1], [0, 0, 1, 1], [], []>} : vector<8x120xbf16>, vector<120x256xbf16>, vector<8x256xf32> -> vector<8x256xf32>
    %c0_3 = arith.constant 0 : index
    %c0_4 = arith.constant 0 : index
    %4 = vector.load %arg3[%c0_3, %c0_4] : memref<1x256xf32, #tpu.memory_space<vmem>>, vector<1x256xf32>
    %5 = vector.broadcast %4 : vector<1x256xf32> to vector<8x256xf32>
    %6 = arith.addf %3, %5 : vector<8x256xf32>
    %cst_5 = arith.constant 0.000000e+00 : f32
    %7 = vector.broadcast %cst_5 : f32 to vector<8x256xf32>
    %8 = arith.maximumf %6, %7 : vector<8x256xf32>
    %9 = arith.truncf %8 : vector<8x256xf32> to vector<8x256xbf16>
    %c0_6 = arith.constant 0 : index
    %c0_7 = arith.constant 0 : index
    %10 = vector.load %arg4[%c0_6, %c0_7] : memref<256x256xbf16, #tpu.memory_space<vmem>>, vector<256x256xbf16>
    %cst_8 = arith.constant dense<0.000000e+00> : vector<8x256xf32>
    %11 = tpu.matmul %9, %10, %cst_8 {dimension_numbers = #tpu.dot_dimension_numbers<[1], [0], [0], [1], [0, 0, 1, 1], [], []>} : vector<8x256xbf16>, vector<256x256xbf16>, vector<8x256xf32> -> vector<8x256xf32>
    %c0_9 = arith.constant 0 : index
    %c0_10 = arith.constant 0 : index
    %12 = vector.load %arg5[%c0_9, %c0_10] : memref<1x256xf32, #tpu.memory_space<vmem>>, vector<1x256xf32>
    %13 = vector.broadcast %12 : vector<1x256xf32> to vector<8x256xf32>
    %14 = arith.addf %11, %13 : vector<8x256xf32>
    %cst_11 = arith.constant 0.000000e+00 : f32
    %15 = vector.broadcast %cst_11 : f32 to vector<8x256xf32>
    %16 = arith.maximumf %14, %15 : vector<8x256xf32>
    %17 = arith.truncf %16 : vector<8x256xf32> to vector<8x256xbf16>
    %c0_12 = arith.constant 0 : index
    %c0_13 = arith.constant 0 : index
    %18 = vector.load %arg6[%c0_12, %c0_13] : memref<256x20xbf16, #tpu.memory_space<vmem>>, vector<256x20xbf16>
    %cst_14 = arith.constant dense<0.000000e+00> : vector<8x20xf32>
    %19 = tpu.matmul %17, %18, %cst_14 {dimension_numbers = #tpu.dot_dimension_numbers<[1], [0], [0], [1], [0, 0, 1, 1], [], []>} : vector<8x256xbf16>, vector<256x20xbf16>, vector<8x20xf32> -> vector<8x20xf32>
    %c0_15 = arith.constant 0 : index
    %c0_16 = arith.constant 0 : index
    %20 = vector.load %arg7[%c0_15, %c0_16] : memref<1x20xf32, #tpu.memory_space<vmem>>, vector<1x20xf32>
    %21 = vector.broadcast %20 : vector<1x20xf32> to vector<8x20xf32>
    %22 = arith.addf %19, %21 : vector<8x20xf32>
    %c0_17 = arith.constant 0 : index
    %c0_18 = arith.constant 0 : index
    %23 = vector.load %arg8[%c0_17, %c0_18] : memref<8x20xf32, #tpu.memory_space<vmem>>, vector<8x20xf32>
    tpu.vector_store %arg8[%c0_17, %c0_18], %22 {strides = array<i32>} : memref<8x20xf32, #tpu.memory_space<vmem>>, vector<8x20xf32>,
    return
  }
  func.func @transform_0(%arg0: i32) -> (i32, i32) {
    %c0_i32 = arith.constant 0 : i32
    %c0_i32_0 = arith.constant 0 : i32
    return %arg0, %c0_i32 : i32, i32
  }
  func.func @transform_1(%arg0: i32) -> (i32, i32) {
    %c0_i32 = arith.constant 0 : i32
    %c0_i32_0 = arith.constant 0 : i32
    %c0_i32_1 = arith.constant 0 : i32
    return %c0_i32, %c0_i32_0 : i32, i32
  }
  func.func @transform_2(%arg0: i32) -> (i32, i32) {
    %c0_i32 = arith.constant 0 : i32
    %c0_i32_0 = arith.constant 0 : i32
    %c0_i32_1 = arith.constant 0 : i32
    return %c0_i32, %c0_i32_0 : i32, i32
  }
  func.func @transform_3(%arg0: i32) -> (i32, i32) {
    %c0_i32 = arith.constant 0 : i32
    %c0_i32_0 = arith.constant 0 : i32
    %c0_i32_1 = arith.constant 0 : i32
    return %c0_i32, %c0_i32_0 : i32, i32
  }
  func.func @transform_4(%arg0: i32) -> (i32, i32) {
    %c0_i32 = arith.constant 0 : i32
    %c0_i32_0 = arith.constant 0 : i32
    %c0_i32_1 = arith.constant 0 : i32
    return %c0_i32, %c0_i32_0 : i32, i32
  }
  func.func @transform_5(%arg0: i32) -> (i32, i32) {
    %c0_i32 = arith.constant 0 : i32
    %c0_i32_0 = arith.constant 0 : i32
    %c0_i32_1 = arith.constant 0 : i32
    return %c0_i32, %c0_i32_0 : i32, i32
  }
  func.func @transform_6(%arg0: i32) -> (i32, i32) {
    %c0_i32 = arith.constant 0 : i32
    %c0_i32_0 = arith.constant 0 : i32
    %c0_i32_1 = arith.constant 0 : i32
    return %c0_i32, %c0_i32_0 : i32, i32
  }
  func.func @transform_7(%arg0: i32) -> (i32, i32) {
    %c0_i32 = arith.constant 0 : i32
    %c0_i32_0 = arith.constant 0 : i32
    return %arg0, %c0_i32 : i32, i32
  }
}

</mosaic_0001>

<bundles_post_ra>
// kernel: actor_fc_forward.1
= control target key start
LH: loop header
LB: loop body
LE: loop exit
PB: predicated region body
PF: predicated region fallthrough
CT: control target
= control target key end

     0   :  { %12 = vsyncpa [#allocation3], 0  ;;  %s1046_s0 = inlined_call_operand.vmem [shape: f32[8,120], index: 0, kind: input, shape index: {}]   ;;  %s1047_s1 = inlined_call_operand.vmem [shape: bf16[120,256], index: 1, kind: input, shape index: {}]   ;;  %s1048_s2 = inlined_call_operand.vmem [shape: f32[1,256], index: 2, kind: input, shape index: {}]   ;;  %s1049_s3 = inlined_call_operand.hbm [shape: bf16[256,256], index: 3, kind: input, shape index: {}]   ;;  %s1050_s4 = inlined_call_operand.vmem [shape: f32[1,256], index: 4, kind: input, shape index: {}]   ;;  %s1051_s5 = inlined_call_operand.vmem [shape: bf16[256,20], index: 5, kind: input, shape index: {}]   ;;  %s1052_s6 = inlined_call_operand.vmem [shape: f32[1,20], index: 6, kind: input, shape index: {}]   ;;  %s1053_s7 = inlined_call_operand.hbm [shape: f32[8,20], index: 7, kind: output, shape index: {}]  }
   0x1   :  { %13 = vsyncpa [#allocation4], 0  ;;  %s872_s24 = smov [#allocation2]   ;;  %s824_s28 = scalar_lea.hbm %s1049_s3, 4096 }
   0x2   :  { %s25_s25 = sshll.u32 %s872_s24, 4  ;;  %p825_p0 = scmp.ne.s32.totalorder %s1049_s3, %s824_s28  ;;  %s26_s25 = int_to_ptr.vmem [resolvable:$true] %s25_s25 }
   0x3   :  { %p828_p1 = scmp.lt.u32.totalorder %s824_s28, %s1049_s3 }
   0x5   :  { %p830_p2 = pnand %p828_p1, %p825_p0 }
   0x7   :  { %833 = shalt.err (!%p830_p2)
}
   0x8   :  { %s834_s10 = scalar_lea.vmem %s26_s25, 4096  ;;  %p839_p4 = scmp.lt.s32.totalorder %s26_s25, %s26_s25 }
   0x9   :  { %p835_p3 = scmp.ne.s32.totalorder %s26_s25, %s834_s10  ;;  %p840_p5 = scmp.lt.s32.totalorder %s834_s10, %s834_s10 }
   0xb   :  { %p841_p6 = por %p840_p5, %p839_p4 }
   0xd   :  { %p842_p7 = pnand %p841_p6, %p835_p3 }
   0xf   :  { %845 = shalt.err (!%p842_p7)
}
  0x10   :  { %s873_s11 = smov 128   ;;  %s874_s12 = smov 8  }
  0x11   :  { %31 = dma.hbm_to_vmem [thread:$0]  %s1049_s3, 4096, %s26_s25, [#allocation3], %s873_s11, %s873_s11, %s874_s12  }
  0x12   :  { %868 = dma.done.wait [#allocation3], 4096  }
  0x13   :  { %869 = vsyncadd [#allocation3], 4294963200  ;;  %v875_v0 = vmov 0   ;;  %v737_v1 = vld [vmem:[%s1047_s1 + $0x4] ss:$8 sps:$4 sm:$0xff]   ;;  %v58_v21 = vld [vmem:[%s1047_s1 + $0x70] sm:$0xff] }
  0x14   :  { %189 = vmatprep.mubr.bf16.mxu0 %v875_v0  ;;  %v739_v2 = vld [vmem:[%s1047_s1] ss:$8 sps:$4 sm:$0xff]   ;;  %157 = vmatprep.subr.bf16.mxu0 %v737_v1  ;;  %v740_v3 = vld [vmem:[%s1047_s1 + $0x14] ss:$8 sps:$4 sm:$0xff]   ;;  %v742_v4 = vld [vmem:[%s1047_s1 + $0x10] ss:$8 sps:$4 sm:$0xff]   ;;  %v658_v25 = vcombine.high %v58_v21, %v58_v21  ;;  %v657_v26 = vcombine.low %v58_v21, %v58_v21  ;;  %v61_v1 = vlaneseq }
  0x15   :  { %158 = vmatpush1.bf16.msra.mxu0 %v739_v2  ;;  %v743_v5 = vld [vmem:[%s1047_s1 + $0x24] ss:$8 sps:$4 sm:$0xff]   ;;  %v745_v6 = vld [vmem:[%s1047_s1 + $0x20] ss:$8 sps:$4 sm:$0xff]   ;;  %v746_v7 = vld [vmem:[%s1047_s1 + $0x34] ss:$8 sps:$4 sm:$0xff]  }
  0x16   :  { %159 = vmatprep.subr.bf16.mxu0 %v740_v3  ;;  %v748_v8 = vld [vmem:[%s1047_s1 + $0x30] ss:$8 sps:$4 sm:$0xff]   ;;  %v760_v9 = vld [vmem:[#allocation2 + $0x4] ss:$8 sps:$4 sm:$0xff]   ;;  %v762_v10 = vld [vmem:[#allocation2] ss:$8 sps:$4 sm:$0xff]  }
  0x17   :  { %v749_v11 = vld [vmem:[%s1047_s1 + $0x44] ss:$8 sps:$4 sm:$0xff]   ;;  %406 = vmatprep.subr.bf16.mxu1 %v760_v9  ;;  %v763_v12 = vld [vmem:[#allocation2 + $0x14] ss:$8 sps:$4 sm:$0xff]   ;;  %v765_v13 = vld [vmem:[#allocation2 + $0x10] ss:$8 sps:$4 sm:$0xff]  }
  0x18   :  { %407 = vmatpush1.bf16.msra.mxu1 %v762_v10  ;;  %v766_v14 = vld [vmem:[#allocation2 + $0x24] ss:$8 sps:$4 sm:$0xff]   ;;  %v751_v15 = vld [vmem:[%s1047_s1 + $0x40] ss:$8 sps:$4 sm:$0xff]   ;;  %v752_v16 = vld [vmem:[%s1047_s1 + $0x54] ss:$8 sps:$4 sm:$0xff]  }
  0x19   :  { %160 = vmatpush1.bf16.msra.mxu0 %v742_v4  ;;  %408 = vmatprep.subr.bf16.mxu1 %v763_v12  ;;  %v768_v17 = vld [vmem:[#allocation2 + $0x20] ss:$8 sps:$4 sm:$0xff]   ;;  %v769_v18 = vld [vmem:[#allocation2 + $0x34] ss:$8 sps:$4 sm:$0xff]   ;;  %v754_v19 = vld [vmem:[%s1047_s1 + $0x50] ss:$8 sps:$4 sm:$0xff]  }
  0x1a   :  { %161 = vmatprep.subr.bf16.mxu0 %v743_v5  ;;  %v755_v20 = vld [vmem:[%s1047_s1 + $0x64] ss:$8 sps:$4 sm:$0xff]   ;;  %v771_v22 = vld [vmem:[#allocation2 + $0x30] ss:$8 sps:$4 sm:$0xff]   ;;  %v757_v24 = vld [vmem:[%s1047_s1 + $0x60] ss:$8 sps:$4 sm:$0xff]  }
  0x1b   :  { %v772_v23 = vld [vmem:[#allocation2 + $0x44] ss:$8 sps:$4 sm:$0xff]   ;;  %vm150_vm0 = vcmask 1043456   ;;  %v774_v27 = vld [vmem:[#allocation2 + $0x40] ss:$8 sps:$4 sm:$0xff]   ;;  %vm146_vm1 = vcmask 982016  }
  0x1c   :  { %409 = vmatpush1.bf16.msra.mxu1 %v765_v13  ;;  %v775_v28 = vld [vmem:[#allocation2 + $0x54] ss:$8 sps:$4 sm:$0xff]   ;;  %v42_v29 = vld [vmem:[%s1046_s0] sm:$0xff]  ;;  %v152_v30 = vsel %vm150_vm0, %v657_v26, 0  ;;  %v777_v31 = vld [vmem:[#allocation2 + $0x50] ss:$8 sps:$4 sm:$0xff]  }
  0x1d   :  { %162 = vmatpush1.bf16.msra.mxu0 %v745_v6  ;;  %410 = vmatprep.subr.bf16.mxu1 %v766_v14  ;;  %v778_v32 = vld [vmem:[#allocation2 + $0x64] ss:$8 sps:$4 sm:$0xff]   ;;  %v43_v33 = vpack.c.bf16 %v42_v29, %v42_v29  ;;  %v780_v34 = vld [vmem:[#allocation2 + $0x60] ss:$8 sps:$4 sm:$0xff]   ;;  %v781_v35 = vld [vmem:[#allocation2 + $0x74] ss:$8 sps:$4 sm:$0xff]  }
  0x1e   :  { %163 = vmatprep.subr.bf16.mxu0 %v746_v7  ;;  %v783_v36 = vld [vmem:[#allocation2 + $0x70] ss:$8 sps:$4 sm:$0xff]   ;;  %v784_v37 = vld [vmem:[#allocation2 + $0x84] ss:$8 sps:$4 sm:$0xff]   ;;  %v786_v38 = vld [vmem:[#allocation2 + $0x80] ss:$8 sps:$4 sm:$0xff]  }
  0x1f   :  { %v787_v39 = vld [vmem:[#allocation2 + $0x94] ss:$8 sps:$4 sm:$0xff]   ;;  %v789_v40 = vld [vmem:[#allocation2 + $0x90] ss:$8 sps:$4 sm:$0xff]   ;;  %v790_v41 = vld [vmem:[#allocation2 + $0xa4] ss:$8 sps:$4 sm:$0xff]  }
  0x20   :  { %411 = vmatpush1.bf16.msra.mxu1 %v768_v17  ;;  %v792_v42 = vld [vmem:[#allocation2 + $0xa0] ss:$8 sps:$4 sm:$0xff]   ;;  %v793_v43 = vld [vmem:[#allocation2 + $0xb4] ss:$8 sps:$4 sm:$0xff]   ;;  %v795_v44 = vld [vmem:[#allocation2 + $0xb0] ss:$8 sps:$4 sm:$0xff]  }
  0x21   :  { %164 = vmatpush1.bf16.msra.mxu0 %v748_v8  ;;  %412 = vmatprep.subr.bf16.mxu1 %v769_v18  ;;  %v796_v45 = vld [vmem:[#allocation2 + $0xc4] ss:$8 sps:$4 sm:$0xff]   ;;  %v798_v46 = vld [vmem:[#allocation2 + $0xc0] ss:$8 sps:$4 sm:$0xff]   ;;  %v799_v47 = vld [vmem:[#allocation2 + $0xd4] ss:$8 sps:$4 sm:$0xff]  }
  0x22   :  { %165 = vmatprep.subr.bf16.mxu0 %v749_v11  ;;  %v801_v48 = vld [vmem:[#allocation2 + $0xd0] ss:$8 sps:$4 sm:$0xff]   ;;  %v802_v49 = vld [vmem:[#allocation2 + $0xe4] ss:$8 sps:$4 sm:$0xff]   ;;  %v804_v50 = vld [vmem:[#allocation2 + $0xe0] ss:$8 sps:$4 sm:$0xff]  }
  0x23   :  { %v805_v51 = vld [vmem:[#allocation2 + $0xf4] ss:$8 sps:$4 sm:$0xff]   ;;  %v807_v52 = vld [vmem:[#allocation2 + $0xf0] ss:$8 sps:$4 sm:$0xff]   ;;  %v808_v53 = vld [vmem:[%s1051_s5 + $0x40] sm:$0xff]   ;;  %v62_v2 = vshrl.u32 %v61_v1, 7 }
  0x24   :  { %413 = vmatpush1.bf16.msra.mxu1 %v771_v22  ;;  %v809_v54 = vld [vmem:[%s1051_s5] sm:$0xff]   ;;  %v810_v55 = vld [vmem:[%s1051_s5 + $0x48] sm:$0xff]   ;;  %v812_v57 = vld [vmem:[%s1051_s5 + $0x50] sm:$0xff]   ;;  %vm626_vm2 = vcmask 162816  }
  0x25   :  { %166 = vmatpush1.bf16.msra.mxu0 %v751_v15  ;;  %414 = vmatprep.subr.bf16.mxu1 %v772_v23  ;;  %v811_v56 = vld [vmem:[%s1051_s5 + $0x8] sm:$0xff]   ;;  %v813_v58 = vld [vmem:[%s1051_s5 + $0x10] sm:$0xff]   ;;  %v814_v59 = vld [vmem:[%s1051_s5 + $0x58] sm:$0xff]   ;;  %v63_v3 = vsub.s32 0, %v62_v2  ;;  %v67_v5 = vsub.s32 1, %v62_v2 }
  0x26   :  { %167 = vmatprep.subr.bf16.mxu0 %v752_v16  ;;  %v815_v60 = vld [vmem:[%s1051_s5 + $0x18] sm:$0xff]   ;;  %v816_v61 = vld [vmem:[%s1051_s5 + $0x60] sm:$0xff]   ;;  %v818_v63 = vld [vmem:[%s1051_s5 + $0x68] sm:$0xff]  }
  0x27   :  { %v817_v62 = vld [vmem:[%s1051_s5 + $0x20] sm:$0xff]   ;;  %v819_v0 = vld [vmem:[%s1051_s5 + $0x28] sm:$0xff]   ;;  %v820_v18 = vld [vmem:[%s1051_s5 + $0x70] sm:$0xff]  }
  0x28   :  { %415 = vmatpush1.bf16.msra.mxu1 %v774_v27  ;;  %v59_v4 = vld [vmem:[%s1048_s2] sm:$0x3]  ;;  %v823_v21 = vld [vmem:[%s1051_s5 + $0x38] sm:$0xff]  }
  0x29   :  { %168 = vmatpush1.bf16.msra.mxu0 %v754_v19  ;;  %416 = vmatprep.subr.bf16.mxu1 %v775_v28  ;;  %v64_v6 = vrot.slane %v59_v4, %v63_v3  ;;  %v68_v7 = vrot.slane %v59_v4, %v67_v5  ;;  %v821_v19 = vld [vmem:[%s1051_s5 + $0x30] sm:$0xff]   ;;  %v234_v22 = vld [vmem:[%s1050_s4] sm:$0x3]  ;;  %s876_s4 = smov [#allocation5]  }
  0x2a   :  { %169 = vmatprep.subr.bf16.mxu0 %v755_v20  ;;  %v822_v20 = vld [vmem:[%s1051_s5 + $0x78] sm:$0xff]   ;;  %v239_v23 = vrot.slane %v234_v22, %v63_v3  ;;  %s634_s30 = sshll.u32 %s876_s4, 4  ;;  %s635_s30 = int_to_ptr.vmem [resolvable:$true] %s634_s30 }
  0x2b   :  { %s846_s8 = scalar_lea.vmem %s635_s30, 128  ;;  %p851_p9 = scmp.lt.s32.totalorder %s635_s30, %s635_s30 }
  0x2c   :  { %417 = vmatpush1.bf16.msra.mxu1 %v777_v31  ;;  %p847_p8 = scmp.ne.s32.totalorder %s635_s30, %s846_s8  ;;  %p852_p10 = scmp.lt.s32.totalorder %s846_s8, %s846_s8 }
  0x2d   :  { %170 = vmatpush1.bf16.msra.mxu0 %v757_v24  ;;  %418 = vmatprep.subr.bf16.mxu1 %v778_v32  ;;  %v243_v24 = vrot.slane %v234_v22, %v67_v5 }
  0x2e   :  { %659 = vmatprep.subr.msk.bf16.mxu0 %vm150_vm0, %v658_v25  ;;  %p853_p11 = por %p852_p10, %p851_p9 }
  0x30   :  { %419 = vmatpush1.bf16.msra.mxu1 %v780_v34  ;;  %p854_p12 = pnand %p853_p11, %p847_p8 }
  0x31   :  { %172 = vmatpush1.bf16.msra.mxu0 %v152_v30  ;;  %420 = vmatprep.subr.bf16.mxu1 %v781_v35 }
  0x32   :  { %710 = vmatprep.subr.bf16.mxu0 %v808_v53 }
  0x34   :  { %660 = vmatmul.mubr.msk.bf16.vlgmr.msra.gmra.mrb[0].mxu0 %vm146_vm1, %v43_v33  ;;  %421 = vmatpush1.bf16.msra.mxu1 %v783_v36  ;;  %v693_v36 = vld [vmem:[%s1052_s6] ss:$0 sm:$0xff] }
  0x35   :  { %422 = vmatprep.subr.bf16.mxu1 %v784_v37  ;;  %711 = vmatpush3.bf16.msra.mxu0 %v809_v54 }
  0x36   :  { %712 = vmatprep.subr.bf16.mxu0 %v810_v55 }
  0x38   :  { %423 = vmatpush1.bf16.msra.mxu1 %v786_v38 }
  0x39   :  { %424 = vmatprep.subr.bf16.mxu1 %v787_v39  ;;  %713 = vmatpush3.bf16.msra.mxu0 %v811_v56 }
  0x3a   :  { %714 = vmatprep.subr.bf16.mxu0 %v812_v57 }
  0x3c   :  { %425 = vmatpush1.bf16.msra.mxu1 %v789_v40 }
  0x3d   :  { %426 = vmatprep.subr.bf16.mxu1 %v790_v41  ;;  %715 = vmatpush3.bf16.msra.mxu0 %v813_v58 }
  0x3e   :  { %716 = vmatprep.subr.bf16.mxu0 %v814_v59 }
  0x40   :  { %427 = vmatpush1.bf16.msra.mxu1 %v792_v42 }
  0x41   :  { %428 = vmatprep.subr.bf16.mxu1 %v793_v43  ;;  %717 = vmatpush3.bf16.msra.mxu0 %v815_v60 }
  0x42   :  { %718 = vmatprep.subr.bf16.mxu0 %v816_v61 }
  0x44   :  { %429 = vmatpush1.bf16.msra.mxu1 %v795_v44 }
  0x45   :  { %430 = vmatprep.subr.bf16.mxu1 %v796_v45  ;;  %719 = vmatpush3.bf16.msra.mxu0 %v817_v62 }
  0x46   :  { %720 = vmatprep.subr.bf16.mxu0 %v818_v63 }
  0x48   :  { %431 = vmatpush1.bf16.msra.mxu1 %v798_v46 }
  0x49   :  { %432 = vmatprep.subr.bf16.mxu1 %v799_v47  ;;  %721 = vmatpush3.bf16.msra.mxu0 %v819_v0 }
  0x4a   :  { %722 = vmatprep.subr.bf16.mxu0 %v820_v18 }
  0x4c   :  { %433 = vmatpush1.bf16.msra.mxu1 %v801_v48 }
  0x4d   :  { %434 = vmatprep.subr.bf16.mxu1 %v802_v49  ;;  %723 = vmatpush3.bf16.msra.mxu0 %v821_v19 }
  0x4e   :  { %724 = vmatprep.subr.bf16.mxu0 %v822_v20 }
  0x50   :  { %435 = vmatpush1.bf16.msra.mxu1 %v804_v50 }
  0x51   :  { %436 = vmatprep.subr.bf16.mxu1 %v805_v51  ;;  %725 = vmatpush3.bf16.msra.mxu0 %v823_v21 }
  0x54   :  { %437 = vmatpush1.bf16.msra.mxu1 %v807_v52 }
 0x107   :  { %v191_v8 = vpop.f32.mrb[0].mxu0 }
 0x108   :  { %v192_v9 = vadd.f32 %v191_v8, %v64_v6  ;;  %v193_v10 = vpop.f32.mrb[1].mxu0 }
 0x109   :  { %v194_v11 = vadd.f32 %v193_v10, %v68_v7  ;;  %v195_v12 = vpop.f32.mrb[2].mxu0 }
 0x10a   :  { %v198_v13 = vmax.f32 %v192_v9, 0.0  ;;  %v196_v14 = vpop.f32.mrb[3].mxu0 }
 0x10b   :  { %v199_v15 = vmax.f32 %v194_v11, 0.0 }
 0x10c   :  { %v200_v17 = vpack.c.bf16 %v198_v13, %v198_v13 }
 0x10d   :  { %v201_v16 = vpack.c.bf16 %v199_v15, %v199_v15 }
 0x10f   :  { %438 = vmatprep.mubr.bf16.mxu1 %v201_v16 }
 0x110   :  { %439 = vmatmul.mubr.bf16.vlgmr.msra.gmra.mrb[0].mxu1 %v200_v17 }
 0x1e3   :  { %v440_v25 = vpop.f32.mrb[0].mxu1 }
 0x1e4   :  { %v441_v26 = vadd.f32 %v440_v25, %v239_v23  ;;  %v442_v27 = vpop.f32.mrb[1].mxu1 }
 0x1e5   :  { %v443_v28 = vadd.f32 %v442_v27, %v243_v24  ;;  %v444_v29 = vpop.f32.mrb[2].mxu1 }
 0x1e6   :  { %v447_v30 = vmax.f32 %v441_v26, 0.0  ;;  %v445_v31 = vpop.f32.mrb[3].mxu1 }
 0x1e7   :  { %v448_v32 = vmax.f32 %v443_v28, 0.0 }
 0x1e8   :  { %v449_v34 = vpack.c.bf16 %v447_v30, %v447_v30 }
 0x1e9   :  { %v450_v33 = vpack.c.bf16 %v448_v32, %v448_v32 }
 0x1eb   :  { %618 = vmatprep.mubr.bf16.mxu0 %v450_v33 }
 0x1ec   :  { %619 = vmatmul.mubr.bf16.vlgmr.msra.gmra.mrb[4].mxu0 %v449_v34 }
 0x2bf   :  { %v726_v35 = vpop.f32.mrb[4].mxu0 }
 0x2c0   :  { %v727_v37 = vpop.f32.mrb[5].mxu0 }
 0x2c1   :  { %v728_v38 = vadd.f32 %v727_v37, %v726_v35  ;;  %v729_v39 = vpop.f32.mrb[6].mxu0 }
 0x2c2   :  { %v730_v40 = vpop.f32.mrb[7].mxu0 }
 0x2c3   :  { %v621_v41 = vadd.f32 %v728_v38, %v693_v36 }
 0x2c5   :  { %627 = vst.msk [vmem:[#allocation5] sm:$0xff] %vm626_vm2, %v621_v41 }
 0x2c6   :  { %857 = shalt.err (!%p854_p12)
}
 0x2c7   :  { %s858_s6 = scalar_lea.hbm %s1053_s7, 128 }
 0x2c8   :  { %p859_p13 = scmp.ne.s32.totalorder %s1053_s7, %s858_s6  ;;  %p862_p0 = scmp.lt.u32.totalorder %s858_s6, %s1053_s7 }
 0x2ca   :  { %p864_p1 = pnand %p862_p0, %p859_p13 }
 0x2cc   :  { %867 = shalt.err (!%p864_p1)
}
 0x2cd   :  { %637 = dma.vmem_to_hbm [thread:$0]  %s635_s30, 128, %s1053_s7, [#allocation4]  }
 0x2ce   :  { %870 = dma.done.wait [#allocation4], 128  }
 0x2cf   :  { %871 = vsyncadd [#allocation4], 4294967168 }
 0x2d0   :  { %641 = vsyncpa [#allocation3], 1 }
 0x2d1   :  { %642 = vsyncpa [#allocation4], 1 }

</bundles_post_ra>
